<compile_context>
chip_gen: v7x
topology: tpu7x:2x2x1
jax: 0.10.0
libtpu: 0.0.40
codegen_flags: <defaults>
</compile_context>

<pallas_src>
import functools

import jax
import jax.numpy as jnp
from jax.experimental import pallas as pl
from jax.experimental.pallas import tpu as pltpu


def _round_up(x, m):
    return (x + m - 1) // m * m


# --------------------------------------------------------------------------
# Fused kernel: KxK conv (stride 1) as K^2 static lane-shift matmuls, then
# per-channel scale/shift (bias + eval-mode BN folded) and optional Mish.
# --------------------------------------------------------------------------
def _conv_bn_mish_kernel(xp_ref, w_ref, scale_ref, shift_ref, o_ref,
                         *, K, Wp, S_out, bn_acti):
    # xp_ref   : (Cin, S_in)  bf16, flattened zero-padded image (row pitch Wp)
    # w_ref    : (K, K, Cout, Cin) bf16
    # scale_ref, shift_ref : (Cout, 1) f32   (conv bias + eval-BN folded in)
    # o_ref    : (Cout, S_out) f32, lane-dense
    acc = jnp.zeros(o_ref.shape, jnp.float32)
    for kh in range(K):
        for kw in range(K):
            xs = xp_ref[:, pl.ds(kh * Wp + kw, S_out)]        # static lane shift
            acc = acc + jnp.dot(w_ref[kh, kw], xs,
                                preferred_element_type=jnp.float32)
    y = acc * scale_ref[...] + shift_ref[...]
    if bn_acti:
        # Mish: x * tanh(softplus(x)), numerically stable softplus, all f32.
        sp = jnp.maximum(y, 0.0) + jnp.log1p(jnp.exp(-jnp.abs(y)))
        y = y * jnp.tanh(sp)
    o_ref[...] = y.astype(o_ref.dtype)


# --------------------------------------------------------------------------
# PyTorch-facing wrapper (NCHW in, NCHW out).  Mirrors Conv(nIn, nOut, kSize,
# stride, padding, bn_acti, bias) with BN in eval mode (running stats folded).
# --------------------------------------------------------------------------
def conv_forward(x_nchw, weight, bias=None, *, stride=1, padding=1, dilation=1,
                 groups=1, bn_acti=False, gamma=None, beta=None,
                 running_mean=None, running_var=None, eps=1e-3):
    # TODO(synk): stride>1 / dilation>1 / groups>1 conv variants are not implemented.
    assert stride in (1, (1, 1)) and dilation in (1, (1, 1)) and groups == 1
    B, Cin, H, W = x_nchw.shape
    Cout, Cin_w, KH, KW = weight.shape
    assert Cin_w == Cin and KH == KW
    K, p = KH, int(padding)

    H_out = H + 2 * p - K + 1
    W_out = W + 2 * p - K + 1
    Wp = _round_up(W + 2 * p, 8)          # row pitch (lane-friendly)
    Hp = H + 2 * p + 1                    # +1 spare zero row for the largest shift
    S_in = Hp * Wp
    S_out = H_out * Wp

    # ---- fold conv bias + eval-mode BatchNorm into per-channel scale/shift ----
    # TODO(synk): training-mode BN (batch statistics) is not computed in-kernel.
    if bn_acti:
        scale = gamma.astype(jnp.float32) / jnp.sqrt(
            running_var.astype(jnp.float32) + eps)
        shift = beta.astype(jnp.float32) - scale * running_mean.astype(jnp.float32)
    else:
        scale = jnp.ones((Cout,), jnp.float32)
        shift = jnp.zeros((Cout,), jnp.float32)
    if bias is not None:
        shift = shift + scale * bias.astype(jnp.float32)
    scale = scale.reshape(Cout, 1)
    shift = shift.reshape(Cout, 1)

    # ---- layout glue: zero-pad, flatten spatial onto lanes, cast to bf16 ----
    xp = jnp.pad(x_nchw.astype(jnp.bfloat16),
                 ((0, 0), (0, 0), (p, p + 1), (p, Wp - W - p)))
    xp_flat = xp.reshape(B, Cin, S_in)
    w_kk = jnp.transpose(weight, (2, 3, 0, 1)).astype(jnp.bfloat16)  # (K,K,Cout,Cin)

    # TODO(synk): for large images add a second grid axis over H_out tiles
    # (halo rows via index_map) to bound VMEM; whole-image blocks are fine here.
    out_flat = pl.pallas_call(
        functools.partial(_conv_bn_mish_kernel, K=K, Wp=Wp, S_out=S_out,
                          bn_acti=bn_acti),
        out_shape=jax.ShapeDtypeStruct((B, Cout, S_out), jnp.float32),
        grid=(B,),
        in_specs=[
            pl.BlockSpec((None, Cin, S_in), lambda b: (b, 0, 0)),
            pl.BlockSpec((K, K, Cout, Cin), lambda b: (0, 0, 0, 0)),
            pl.BlockSpec((Cout, 1), lambda b: (0, 0)),
            pl.BlockSpec((Cout, 1), lambda b: (0, 0)),
        ],
        out_specs=pl.BlockSpec((None, Cout, S_out), lambda b: (b, 0, 0)),
        compiler_params=pltpu.CompilerParams(dimension_semantics=("parallel",)),
    )(xp_flat, w_kk, scale, shift)

    # Drop the junk columns (row pitch Wp > W_out).  No transposes needed.
    out = out_flat.reshape(B, Cout, H_out, Wp)[:, :, :, :W_out]
    return out


# --------------------------------------------------------------------------
# Pure-JAX reference (independent of the kernel logic).
# --------------------------------------------------------------------------
def reference_forward(x, weight, bias=None, *, padding=1, bn_acti=False, gamma=None,
                      beta=None, running_mean=None, running_var=None, eps=1e-3):
    y = jax.lax.conv_general_dilated(
        x, weight, (1, 1), ((padding, padding), (padding, padding)),
        dimension_numbers=("NCHW", "OIHW", "NCHW"),
        precision=jax.lax.Precision.HIGHEST)
    if bias is not None:
        y = y + bias.reshape(1, -1, 1, 1)
    if bn_acti:
        scale = gamma / jnp.sqrt(running_var + eps)
        y = y * scale.reshape(1, -1, 1, 1) \
            + (beta - scale * running_mean).reshape(1, -1, 1, 1)
        sp = jnp.maximum(y, 0.0) + jnp.log1p(jnp.exp(-jnp.abs(y)))
        y = y * jnp.tanh(sp)
    return y


if __name__ == "__main__":
    B, nIn, nOut, H, W, K = 2, 4, 8, 16, 16, 3

    key = jax.random.PRNGKey(0)
    kx, kw, kb, kg, kbe, km, kv = jax.random.split(key, 7)

    x = jax.random.normal(kx, (B, nIn, H, W), jnp.float32)                 # NCHW
    weight = 0.3 * jax.random.normal(kw, (nOut, nIn, K, K), jnp.float32)   # OIHW
    bias = 0.1 * jax.random.normal(kb, (nOut,), jnp.float32)
    gamma = 1.0 + 0.1 * jax.random.normal(kg, (nOut,), jnp.float32)
    beta = 0.1 * jax.random.normal(kbe, (nOut,), jnp.float32)
    running_mean = 0.1 * jax.random.normal(km, (nOut,), jnp.float32)
    running_var = 0.5 + jnp.abs(jax.random.normal(kv, (nOut,), jnp.float32))

    # bf16-rounded operand copies so the f32 reference sees the same quantization.
    xq = x.astype(jnp.bfloat16).astype(jnp.float32)
    wq = weight.astype(jnp.bfloat16).astype(jnp.float32)

    # ---- Conv(nIn, nOut, 3, 1, 1, bn_acti=True, bias=False): conv -> BN(eval) -> Mish
    out = conv_forward(x, weight, bias=None, stride=1, padding=1, bn_acti=True,
                       gamma=gamma, beta=beta, running_mean=running_mean,
                       running_var=running_var, eps=1e-3)
    out = jax.block_until_ready(out)
    ref = reference_forward(xq, wq, bias=None, padding=1, bn_acti=True, gamma=gamma,
                            beta=beta, running_mean=running_mean,
                            running_var=running_var, eps=1e-3)
    assert out.shape == (B, nOut, H, W), out.shape
    assert jnp.allclose(out, ref, atol=2e-3, rtol=2e-3), \
        float(jnp.max(jnp.abs(out - ref)))

    # ---- plain Conv(..., bn_acti=False) with bias (default-path coverage) ----
    out2 = conv_forward(x, weight, bias=bias, stride=1, padding=1, bn_acti=False)
    out2 = jax.block_until_ready(out2)
    ref2 = reference_forward(xq, wq, bias=bias, padding=1, bn_acti=False)
    assert out2.shape == (B, nOut, H, W), out2.shape
    assert jnp.allclose(out2, ref2, atol=2e-3, rtol=2e-3), \
        float(jnp.max(jnp.abs(out2 - ref2)))

    print("KERNEL_OK")
</pallas_src>

<mosaic_0001>
module attributes {stable_mosaic.version = 11 : i64} {
  func.func @_conv_bn_mish_kernel(%arg0: i32, %arg1: memref<1x4x456xbf16, #tpu.memory_space<vmem>>, %arg2: memref<3x3x8x4xbf16, #tpu.memory_space<vmem>>, %arg3: memref<8x1xf32, #tpu.memory_space<vmem>>, %arg4: memref<8x1xf32, #tpu.memory_space<vmem>>, %arg5: memref<1x8x384xf32, #tpu.memory_space<vmem>>) attributes {dimension_semantics = [#tpu.dimension_semantics<parallel>], iteration_bounds = array<i64: 2>, scalar_prefetch = 0 : i64, scratch_operands = 0 : i64, tpu.core_type = #tpu.core_type<tc>, window_params = [{transform_indices = @transform_0, window_bounds = array<i64: 1, 4, 456>}, {pipeline_mode = #tpu.pipeline_mode<synchronous>, transform_indices = @transform_1, window_bounds = array<i64: 3, 3, 8, 4>}, {pipeline_mode = #tpu.pipeline_mode<synchronous>, transform_indices = @transform_2, window_bounds = array<i64: 8, 1>}, {pipeline_mode = #tpu.pipeline_mode<synchronous>, transform_indices = @transform_3, window_bounds = array<i64: 8, 1>}, {transform_indices = @transform_4, window_bounds = array<i64: 1, 8, 384>}]} {
    %cst = arith.constant 0.000000e+00 : f32
    %0 = vector.broadcast %cst : f32 to vector<8x384xf32>
    %c0 = arith.constant 0 : index
    %c0_0 = arith.constant 0 : index
    %c0_1 = arith.constant 0 : index
    %1 = vector.load %arg1[%c0, %c0_0, %c0_1] : memref<1x4x456xbf16, #tpu.memory_space<vmem>>, vector<1x4x384xbf16>
    %2 = vector.shape_cast %1 : vector<1x4x384xbf16> to vector<4x384xbf16>
    %c0_2 = arith.constant 0 : index
    %c0_3 = arith.constant 0 : index
    %c0_4 = arith.constant 0 : index
    %c0_5 = arith.constant 0 : index
    %3 = vector.load %arg2[%c0_2, %c0_3, %c0_4, %c0_5] : memref<3x3x8x4xbf16, #tpu.memory_space<vmem>>, vector<1x1x8x4xbf16>
    %4 = vector.shape_cast %3 : vector<1x1x8x4xbf16> to vector<8x4xbf16>
    %cst_6 = arith.constant dense<0.000000e+00> : vector<8x384xf32>
    %5 = tpu.matmul %4, %2, %cst_6 {dimension_numbers = #tpu.dot_dimension_numbers<[1], [0], [0], [1], [0, 0, 1, 1], [], []>} : vector<8x4xbf16>, vector<4x384xbf16>, vector<8x384xf32> -> vector<8x384xf32>
    %6 = arith.addf %0, %5 : vector<8x384xf32>
    %c0_7 = arith.constant 0 : index
    %c0_8 = arith.constant 0 : index
    %c1 = arith.constant 1 : index
    %7 = vector.load %arg1[%c0_7, %c0_8, %c1] : memref<1x4x456xbf16, #tpu.memory_space<vmem>>, vector<1x4x384xbf16>
    %8 = vector.shape_cast %7 : vector<1x4x384xbf16> to vector<4x384xbf16>
    %c0_9 = arith.constant 0 : index
    %c1_10 = arith.constant 1 : index
    %c0_11 = arith.constant 0 : index
    %c0_12 = arith.constant 0 : index
    %9 = vector.load %arg2[%c0_9, %c1_10, %c0_11, %c0_12] : memref<3x3x8x4xbf16, #tpu.memory_space<vmem>>, vector<1x1x8x4xbf16>
    %10 = vector.shape_cast %9 : vector<1x1x8x4xbf16> to vector<8x4xbf16>
    %cst_13 = arith.constant dense<0.000000e+00> : vector<8x384xf32>
    %11 = tpu.matmul %10, %8, %cst_13 {dimension_numbers = #tpu.dot_dimension_numbers<[1], [0], [0], [1], [0, 0, 1, 1], [], []>} : vector<8x4xbf16>, vector<4x384xbf16>, vector<8x384xf32> -> vector<8x384xf32>
    %12 = arith.addf %6, %11 : vector<8x384xf32>
    %c0_14 = arith.constant 0 : index
    %c0_15 = arith.constant 0 : index
    %c2 = arith.constant 2 : index
    %13 = vector.load %arg1[%c0_14, %c0_15, %c2] : memref<1x4x456xbf16, #tpu.memory_space<vmem>>, vector<1x4x384xbf16>
    %14 = vector.shape_cast %13 : vector<1x4x384xbf16> to vector<4x384xbf16>
    %c0_16 = arith.constant 0 : index
    %c2_17 = arith.constant 2 : index
    %c0_18 = arith.constant 0 : index
    %c0_19 = arith.constant 0 : index
    %15 = vector.load %arg2[%c0_16, %c2_17, %c0_18, %c0_19] : memref<3x3x8x4xbf16, #tpu.memory_space<vmem>>, vector<1x1x8x4xbf16>
    %16 = vector.shape_cast %15 : vector<1x1x8x4xbf16> to vector<8x4xbf16>
    %cst_20 = arith.constant dense<0.000000e+00> : vector<8x384xf32>
    %17 = tpu.matmul %16, %14, %cst_20 {dimension_numbers = #tpu.dot_dimension_numbers<[1], [0], [0], [1], [0, 0, 1, 1], [], []>} : vector<8x4xbf16>, vector<4x384xbf16>, vector<8x384xf32> -> vector<8x384xf32>
    %18 = arith.addf %12, %17 : vector<8x384xf32>
    %c0_21 = arith.constant 0 : index
    %c0_22 = arith.constant 0 : index
    %c24 = arith.constant 24 : index
    %19 = vector.load %arg1[%c0_21, %c0_22, %c24] : memref<1x4x456xbf16, #tpu.memory_space<vmem>>, vector<1x4x384xbf16>
    %20 = vector.shape_cast %19 : vector<1x4x384xbf16> to vector<4x384xbf16>
    %c1_23 = arith.constant 1 : index
    %c0_24 = arith.constant 0 : index
    %c0_25 = arith.constant 0 : index
    %c0_26 = arith.constant 0 : index
    %21 = vector.load %arg2[%c1_23, %c0_24, %c0_25, %c0_26] : memref<3x3x8x4xbf16, #tpu.memory_space<vmem>>, vector<1x1x8x4xbf16>
    %22 = vector.shape_cast %21 : vector<1x1x8x4xbf16> to vector<8x4xbf16>
    %cst_27 = arith.constant dense<0.000000e+00> : vector<8x384xf32>
    %23 = tpu.matmul %22, %20, %cst_27 {dimension_numbers = #tpu.dot_dimension_numbers<[1], [0], [0], [1], [0, 0, 1, 1], [], []>} : vector<8x4xbf16>, vector<4x384xbf16>, vector<8x384xf32> -> vector<8x384xf32>
    %24 = arith.addf %18, %23 : vector<8x384xf32>
    %c0_28 = arith.constant 0 : index
    %c0_29 = arith.constant 0 : index
    %c25 = arith.constant 25 : index
    %25 = vector.load %arg1[%c0_28, %c0_29, %c25] : memref<1x4x456xbf16, #tpu.memory_space<vmem>>, vector<1x4x384xbf16>
    %26 = vector.shape_cast %25 : vector<1x4x384xbf16> to vector<4x384xbf16>
    %c1_30 = arith.constant 1 : index
    %c1_31 = arith.constant 1 : index
    %c0_32 = arith.constant 0 : index
    %c0_33 = arith.constant 0 : index
    %27 = vector.load %arg2[%c1_30, %c1_31, %c0_32, %c0_33] : memref<3x3x8x4xbf16, #tpu.memory_space<vmem>>, vector<1x1x8x4xbf16>
    %28 = vector.shape_cast %27 : vector<1x1x8x4xbf16> to vector<8x4xbf16>
    %cst_34 = arith.constant dense<0.000000e+00> : vector<8x384xf32>
    %29 = tpu.matmul %28, %26, %cst_34 {dimension_numbers = #tpu.dot_dimension_numbers<[1], [0], [0], [1], [0, 0, 1, 1], [], []>} : vector<8x4xbf16>, vector<4x384xbf16>, vector<8x384xf32> -> vector<8x384xf32>
    %30 = arith.addf %24, %29 : vector<8x384xf32>
    %c0_35 = arith.constant 0 : index
    %c0_36 = arith.constant 0 : index
    %c26 = arith.constant 26 : index
    %31 = vector.load %arg1[%c0_35, %c0_36, %c26] : memref<1x4x456xbf16, #tpu.memory_space<vmem>>, vector<1x4x384xbf16>
    %32 = vector.shape_cast %31 : vector<1x4x384xbf16> to vector<4x384xbf16>
    %c1_37 = arith.constant 1 : index
    %c2_38 = arith.constant 2 : index
    %c0_39 = arith.constant 0 : index
    %c0_40 = arith.constant 0 : index
    %33 = vector.load %arg2[%c1_37, %c2_38, %c0_39, %c0_40] : memref<3x3x8x4xbf16, #tpu.memory_space<vmem>>, vector<1x1x8x4xbf16>
    %34 = vector.shape_cast %33 : vector<1x1x8x4xbf16> to vector<8x4xbf16>
    %cst_41 = arith.constant dense<0.000000e+00> : vector<8x384xf32>
    %35 = tpu.matmul %34, %32, %cst_41 {dimension_numbers = #tpu.dot_dimension_numbers<[1], [0], [0], [1], [0, 0, 1, 1], [], []>} : vector<8x4xbf16>, vector<4x384xbf16>, vector<8x384xf32> -> vector<8x384xf32>
    %36 = arith.addf %30, %35 : vector<8x384xf32>
    %c0_42 = arith.constant 0 : index
    %c0_43 = arith.constant 0 : index
    %c48 = arith.constant 48 : index
    %37 = vector.load %arg1[%c0_42, %c0_43, %c48] : memref<1x4x456xbf16, #tpu.memory_space<vmem>>, vector<1x4x384xbf16>
    %38 = vector.shape_cast %37 : vector<1x4x384xbf16> to vector<4x384xbf16>
    %c2_44 = arith.constant 2 : index
    %c0_45 = arith.constant 0 : index
    %c0_46 = arith.constant 0 : index
    %c0_47 = arith.constant 0 : index
    %39 = vector.load %arg2[%c2_44, %c0_45, %c0_46, %c0_47] : memref<3x3x8x4xbf16, #tpu.memory_space<vmem>>, vector<1x1x8x4xbf16>
    %40 = vector.shape_cast %39 : vector<1x1x8x4xbf16> to vector<8x4xbf16>
    %cst_48 = arith.constant dense<0.000000e+00> : vector<8x384xf32>
    %41 = tpu.matmul %40, %38, %cst_48 {dimension_numbers = #tpu.dot_dimension_numbers<[1], [0], [0], [1], [0, 0, 1, 1], [], []>} : vector<8x4xbf16>, vector<4x384xbf16>, vector<8x384xf32> -> vector<8x384xf32>
    %42 = arith.addf %36, %41 : vector<8x384xf32>
    %c0_49 = arith.constant 0 : index
    %c0_50 = arith.constant 0 : index
    %c49 = arith.constant 49 : index
    %43 = vector.load %arg1[%c0_49, %c0_50, %c49] : memref<1x4x456xbf16, #tpu.memory_space<vmem>>, vector<1x4x384xbf16>
    %44 = vector.shape_cast %43 : vector<1x4x384xbf16> to vector<4x384xbf16>
    %c2_51 = arith.constant 2 : index
    %c1_52 = arith.constant 1 : index
    %c0_53 = arith.constant 0 : index
    %c0_54 = arith.constant 0 : index
    %45 = vector.load %arg2[%c2_51, %c1_52, %c0_53, %c0_54] : memref<3x3x8x4xbf16, #tpu.memory_space<vmem>>, vector<1x1x8x4xbf16>
    %46 = vector.shape_cast %45 : vector<1x1x8x4xbf16> to vector<8x4xbf16>
    %cst_55 = arith.constant dense<0.000000e+00> : vector<8x384xf32>
    %47 = tpu.matmul %46, %44, %cst_55 {dimension_numbers = #tpu.dot_dimension_numbers<[1], [0], [0], [1], [0, 0, 1, 1], [], []>} : vector<8x4xbf16>, vector<4x384xbf16>, vector<8x384xf32> -> vector<8x384xf32>
    %48 = arith.addf %42, %47 : vector<8x384xf32>
    %c0_56 = arith.constant 0 : index
    %c0_57 = arith.constant 0 : index
    %c50 = arith.constant 50 : index
    %49 = vector.load %arg1[%c0_56, %c0_57, %c50] : memref<1x4x456xbf16, #tpu.memory_space<vmem>>, vector<1x4x384xbf16>
    %50 = vector.shape_cast %49 : vector<1x4x384xbf16> to vector<4x384xbf16>
    %c2_58 = arith.constant 2 : index
    %c2_59 = arith.constant 2 : index
    %c0_60 = arith.constant 0 : index
    %c0_61 = arith.constant 0 : index
    %51 = vector.load %arg2[%c2_58, %c2_59, %c0_60, %c0_61] : memref<3x3x8x4xbf16, #tpu.memory_space<vmem>>, vector<1x1x8x4xbf16>
    %52 = vector.shape_cast %51 : vector<1x1x8x4xbf16> to vector<8x4xbf16>
    %cst_62 = arith.constant dense<0.000000e+00> : vector<8x384xf32>
    %53 = tpu.matmul %52, %50, %cst_62 {dimension_numbers = #tpu.dot_dimension_numbers<[1], [0], [0], [1], [0, 0, 1, 1], [], []>} : vector<8x4xbf16>, vector<4x384xbf16>, vector<8x384xf32> -> vector<8x384xf32>
    %54 = arith.addf %48, %53 : vector<8x384xf32>
    %c0_63 = arith.constant 0 : index
    %c0_64 = arith.constant 0 : index
    %55 = vector.load %arg3[%c0_63, %c0_64] : memref<8x1xf32, #tpu.memory_space<vmem>>, vector<8x1xf32>
    %56 = vector.broadcast %55 : vector<8x1xf32> to vector<8x384xf32>
    %57 = arith.mulf %54, %56 : vector<8x384xf32>
    %c0_65 = arith.constant 0 : index
    %c0_66 = arith.constant 0 : index
    %58 = vector.load %arg4[%c0_65, %c0_66] : memref<8x1xf32, #tpu.memory_space<vmem>>, vector<8x1xf32>
    %59 = vector.broadcast %58 : vector<8x1xf32> to vector<8x384xf32>
    %60 = arith.addf %57, %59 : vector<8x384xf32>
    %cst_67 = arith.constant 0.000000e+00 : f32
    %61 = vector.broadcast %cst_67 : f32 to vector<8x384xf32>
    %62 = arith.maximumf %60, %61 : vector<8x384xf32>
    %63 = math.absf %60 : vector<8x384xf32>
    %cst_68 = arith.constant 0.000000e+00 : f32
    %64 = vector.broadcast %cst_68 : f32 to vector<8x384xf32>
    %65 = arith.subf %64, %63 : vector<8x384xf32>
    %66 = math.exp %65 : vector<8x384xf32>
    %67 = math.log1p %66 : vector<8x384xf32>
    %68 = arith.addf %62, %67 : vector<8x384xf32>
    %69 = math.tanh %68 : vector<8x384xf32>
    %70 = arith.mulf %60, %69 : vector<8x384xf32>
    %c0_69 = arith.constant 0 : index
    %c0_70 = arith.constant 0 : index
    %c0_71 = arith.constant 0 : index
    %71 = vector.load %arg5[%c0_69, %c0_70, %c0_71] : memref<1x8x384xf32, #tpu.memory_space<vmem>>, vector<1x8x384xf32>
    %72 = vector.shape_cast %71 : vector<1x8x384xf32> to vector<8x384xf32>
    %73 = vector.shape_cast %70 : vector<8x384xf32> to vector<1x8x384xf32>
    tpu.vector_store %arg5[%c0_69, %c0_70, %c0_71], %73 {strides = array<i32>} : memref<1x8x384xf32, #tpu.memory_space<vmem>>, vector<1x8x384xf32>,
    return
  }
  func.func @transform_0(%arg0: i32) -> (i32, i32, i32) {
    %c0_i32 = arith.constant 0 : i32
    %c0_i32_0 = arith.constant 0 : i32
    %c0_i32_1 = arith.constant 0 : i32
    return %arg0, %c0_i32, %c0_i32_0 : i32, i32, i32
  }
  func.func @transform_1(%arg0: i32) -> (i32, i32, i32, i32) {
    %c0_i32 = arith.constant 0 : i32
    %c0_i32_0 = arith.constant 0 : i32
    %c0_i32_1 = arith.constant 0 : i32
    %c0_i32_2 = arith.constant 0 : i32
    %c0_i32_3 = arith.constant 0 : i32
    return %c0_i32, %c0_i32_0, %c0_i32_1, %c0_i32_2 : i32, i32, i32, i32
  }
  func.func @transform_2(%arg0: i32) -> (i32, i32) {
    %c0_i32 = arith.constant 0 : i32
    %c0_i32_0 = arith.constant 0 : i32
    %c0_i32_1 = arith.constant 0 : i32
    return %c0_i32, %c0_i32_0 : i32, i32
  }
  func.func @transform_3(%arg0: i32) -> (i32, i32) {
    %c0_i32 = arith.constant 0 : i32
    %c0_i32_0 = arith.constant 0 : i32
    %c0_i32_1 = arith.constant 0 : i32
    return %c0_i32, %c0_i32_0 : i32, i32
  }
  func.func @transform_4(%arg0: i32) -> (i32, i32, i32) {
    %c0_i32 = arith.constant 0 : i32
    %c0_i32_0 = arith.constant 0 : i32
    %c0_i32_1 = arith.constant 0 : i32
    return %arg0, %c0_i32, %c0_i32_0 : i32, i32, i32
  }
}

</mosaic_0001>

<bundles_post_ra>
// kernel: tpu_custom_call.1
= control target key start
LH: loop header
LB: loop body
LE: loop exit
PB: predicated region body
PF: predicated region fallthrough
CT: control target
= control target key end

     0   :  { %9 = vsyncpa [#allocation3], 0  ;;  %s2104_s0 = inlined_call_operand.vmem [shape: bf16[2,4,456], index: 0, kind: input, shape index: {}]   ;;  %s2105_s1 = inlined_call_operand.vmem [shape: bf16[3,3,8,4], index: 1, kind: input, shape index: {}]   ;;  %s2106_s2 = inlined_call_operand.vmem [shape: f32[8,1], index: 2, kind: input, shape index: {}]   ;;  %s2107_s3 = inlined_call_operand.vmem [shape: f32[8,1], index: 3, kind: input, shape index: {}]   ;;  %s2108_s4 = inlined_call_operand.hbm [shape: f32[2,8,384], index: 4, kind: output, shape index: {}]  }
   0x1   :  { %11 = vsyncpa [#allocation3 + $0x1], 0  ;;  %s1844_s15 = smov 0   ;;  %s1846_s16 = smov 0  }
   0x2   :  { %s1848_s17 = smov 0   ;;  %s1850_s18 = smov 0  }
   0x3 LB: > { %s1865_s19 = sadd.s32 4294967295, %s1804_s18   ;;  %s1486_s20 = sadd.s32 4294967294, %s1804_s18   ;;  %s1804_s18 = sphi %s1850_s18, %s2114_s18   ;;  %s1800_s17 = sphi %s1848_s17, %s2113_s17   ;;  %s1796_s16 = sphi %s1846_s16, %s2112_s16   ;;  %s1792_s15 = sphi %s1844_s15, %s2111_s15  }
   0x4   : > { %s1869_s21 = sadd.s32 1, %s1804_s18   ;;  %s113_s22 = sadd.s32 1, %s1800_s17 }
   0x5   : > { %s110_s23 = ssub.s32 %s1804_s18, %s1869_s21  ;;  %p123_p0 = scmp.ne.s32.totalorder %s1800_s17, %s1796_s16 }
   0x6   : > { %p111_p1 = scmp.eq.s32.totalorder %s110_s23, 0  ;;  %p124_p2 = scmp.eq.s32.totalorder %s1865_s19, 1 }
   0x7   : > { %p129_p3 = scmp.ne.s32.totalorder %s1796_s16, %s1792_s15  ;;  %p130_p4 = scmp.eq.s32.totalorder %s1486_s20, 1 }
   0x8   : > { %s1880_s24 = scalar_select %p111_p1, %s1800_s17, %s113_s22  }
   0x9   : > { %p1882_p5 = por %p124_p2, %p123_p0  ;;  %p1886_p6 = por %p130_p4, %p129_p3 }
   0xa   : > { %p1489_p7 = scmp.ge.s32.totalorder %s1804_s18, 1  ;;  %p165_p8 = scmp.lt.s32.totalorder %s1804_s18, 3 }
   0xc   : > { %p166_p9 = pnand %p1489_p7, %p165_p8 }
   0xd   : > { %p191_p10 = scmp.lt.s32.totalorder (!%p166_p9), %s1865_s19, 1  ;;  %v207_v0 = vlaneseq (!%p166_p9)  ;;  %v1806_v1 = vmov (!%p166_p9), 1983009808   ;;  %v1807_v5 = vmov (!%p166_p9), 0.0   ;;  %v1808_v6 = vmov (!%p166_p9), 0   ;;  %s1810_s6 = smov (!%p166_p9), 127  }
   0xe   : > { %169 = sbr.rel (%p166_p9) target bundleno = 528 (0x210), region = 36  ;;  %v205_v2 = vunpack.c.l.s4 (!%p166_p9), %v1806_v1  ;;  %1549 = vmatprep.subr.bf16.mxu1 (!%p166_p9), %v1807_v5  ;;  %278 = vmatprep.mubr.bf16.mxu0 (!%p166_p9), %v1808_v6  ;;  %vm1809_vm0 = vmmov (!%p166_p9), 0   ;;  %s1811_s7 = smov (!%p166_p9), 126   ;;  %v1340_v18 = vld [vmem:[%s2106_s2] sm:$0xff] (!%p166_p9)  ;;  %vm228_vm1 = vcmask (!%p166_p9), 1039360   ;;  %vm236_vm2 = vcmask (!%p166_p9), 1041408  }
   0xf   : > { %v208_v3 = vshrl.u32 (!%p166_p9), %v207_v0, 7  ;;  %1720 = vset.pattern.permute.xlu0 (!%p166_p9), %v1808_v6  ;;  %1721 = vset.pattern.permute.xlu1 (!%p166_p9), %v1808_v6  ;;  %s1812_s8 = smov (!%p166_p9), 104   ;;  %s1813_s9 = smov (!%p166_p9), 103   ;;  %v1349_v19 = vld [vmem:[%s2107_s3] sm:$0xff] (!%p166_p9)  ;;  %vm232_vm3 = vcmask (!%p166_p9), 31744   ;;  %vm466_vm4 = vcmask (!%p166_p9), 1031168  }
  0x10   : > { %v206_v4 = vunpack.c.0.s8 (!%p166_p9), %v205_v2  ;;  %1551 = vmatprep.mubr.msk.bf16.mxu1 (!%p166_p9), %vm1809_vm0, %v1807_v5  ;;  %s1814_s10 = smov (!%p166_p9), 102   ;;  %s1815_s11 = smov (!%p166_p9), 80   ;;  %v1492_v29 = vld [vmem:[%s2105_s1 + $0x4] sm:$0xf] (!%p166_p9)  ;;  %vm595_vm5 = vcmask (!%p166_p9), 850944   ;;  %vm724_vm6 = vcmask (!%p166_p9), 842752  }
  0x11   : > { %s1816_s12 = smov (!%p166_p9), 79   ;;  %s1817_s13 = smov (!%p166_p9), 78   ;;  %v198_v42 = vld [vmem:[%s2105_s1] sm:$0xf] (!%p166_p9)  ;;  %v1499_v53 = vld [vmem:[%s2105_s1 + $0x8] sm:$0xf] (!%p166_p9) }
  0x12   : > { %v209_v7 = vsub.s32 (!%p166_p9), %v206_v4, %v208_v3  ;;  %vm853_vm7 = vcmask (!%p166_p9), 834560   ;;  %v1503_v63 = vld [vmem:[%s2105_s1 + $0xc] sm:$0xf] (!%p166_p9)  ;;  %vm982_vm8 = vcmask (!%p166_p9), 654336   ;;  %vm1111_vm9 = vcmask (!%p166_p9), 646144   ;;  %s1668_s30 = smul.u32 (!%p166_p9), 384, %s1865_s19 }
  0x13   : > { %vm1240_vm10 = vcmask (!%p166_p9), 637952  }
  0x15   : > { %s192_s27 = scalar_select %p191_p10, %s1865_s19, 1 }
  0x17   : > { %s1530_s28 = sshll.u32 %s192_s27, 3 }
  0x18   : > { %s195_s5 = scalar_lea.vmem %s2104_s0, %s1530_s28  ;;  %s188_s28 = sand.u32 1, %s1796_s16  }
  0x19   : > { %v199_v8 = vld [vmem:[%s195_s5] sm:$0xff]  ;;  %s1667_s29 = smul.u32 24, %s188_s28  ;;  %s1413_s19 = scalar_lea.sflag [#allocation3], %s188_s28 }
  0x1a   : > { %v197_v9 = vld [vmem:[%s195_s5] sm:$0x3f]  ;;  %v210_v10 = vrot.slane %v199_v8, %v209_v7  ;;  %v203_v11 = vcombine.high %v199_v8, %v199_v8 }
  0x1b   : > { %v1903_v12 = vrot.slane %v197_v9, %v209_v7  ;;  %v328_v13 = vcombine.high %v197_v9, %v197_v9  ;;  %s190_s5 = scalar_lea.vmem [#allocation2], %s1667_s29 }
  0x1c   : > { %220 = vrot.lane.b32.xlu0 %v210_v10, %s1810_s6  ;;  %v218_v14 = vcombine.high %v210_v10, %v210_v10  ;;  %v217_v15 = vrot.slane %v203_v11, %v209_v7  ;;  %v1507_v11 = vld [vmem:[%s2105_s1 + $0x10] sm:$0xf] }
  0x1d   : > { %v1905_v16 = vrot.slane %v328_v13, %v209_v7  ;;  %v343_v23 = vcombine.high %v1903_v12, %v1903_v12  ;;  %v348_v31 = vsel %vm236_vm2, %v1903_v12, 0 }
  0x1e   : > { %224 = vrot.lane.b32.xlu1 %v217_v15, %s1810_s6  ;;  %v219_v17 = vcombine.high %v217_v15, %v217_v15 }
  0x1f   : > { %v354_v33 = vsel %vm236_vm2, %v1905_v16, 0 }
  0x20   : > { %222 = vrot.lane.b32.xlu0 %v218_v14, %s1810_s6 }
  0x22   : > { %226 = vrot.lane.b32.xlu1 %v219_v17, %s1810_s6  ;;  %s1427_s6 = sshll.u32 %s190_s5, 4  ;;  %s2064_s6 = int_to_ptr.vmem [resolvable:$true] %s1427_s6 }
  0x24   : > { %458 = vrot.lane.b32.xlu0 %v210_v10, %s1811_s7 }
  0x26   : > { %460 = vrot.lane.b32.xlu1 %v218_v14, %s1811_s7 }
  0x28   : > { %462 = vrot.lane.b32.xlu0 %v217_v15, %s1811_s7 }
  0x2a   : > { %464 = vrot.lane.b32.xlu1 %v219_v17, %s1811_s7 }
  0x2c   : > { %587 = vrot.lane.b32.xlu0 %v210_v10, %s1812_s8 }
  0x2e   : > { %589 = vrot.lane.b32.xlu1 %v218_v14, %s1812_s8 }
  0x30   : > { %591 = vrot.lane.b32.xlu0 %v217_v15, %s1812_s8 }
  0x32   : > { %593 = vrot.lane.b32.xlu1 %v219_v17, %s1812_s8 }
  0x34   : > { %716 = vrot.lane.b32.xlu0 %v210_v10, %s1813_s9 }
  0x36   : > { %718 = vrot.lane.b32.xlu1 %v218_v14, %s1813_s9 }
  0x38   : > { %720 = vrot.lane.b32.xlu0 %v217_v15, %s1813_s9 }
  0x3a   : > { %722 = vrot.lane.b32.xlu1 %v219_v17, %s1813_s9  ;;  %s2062_s9 = scalar_lea.hbm %s2108_s4, %s1668_s30 }
  0x3c   : > { %845 = vrot.lane.b32.xlu0 %v210_v10, %s1814_s10 }
  0x3e   : > { %847 = vrot.lane.b32.xlu1 %v218_v14, %s1814_s10 }
  0x40   : > { %849 = vrot.lane.b32.xlu0 %v217_v15, %s1814_s10 }
  0x42   : > { %851 = vrot.lane.b32.xlu1 %v219_v17, %s1814_s10  ;;  %s1742_s10 = scalar_lea.vmem %s2064_s6, 384 }
  0x43   : > { %p1743_p11 = scmp.ne.s32.totalorder %s2064_s6, %s1742_s10 }
  0x44   : > { %974 = vrot.lane.b32.xlu0 %v210_v10, %s1815_s11 }
  0x45   : > { %p1744_p12 = pnand %p1743_p11, %p1882_p5 }
  0x46   : > { %976 = vrot.lane.b32.xlu1 %v218_v14, %s1815_s11 }
  0x47   : > { %p1745_p13 = pneg %p1744_p12 }
  0x48   : > { %978 = vrot.lane.b32.xlu0 %v217_v15, %s1815_s11 }
  0x4a   : > { %980 = vrot.lane.b32.xlu1 %v219_v17, %s1815_s11  ;;  %s1818_s11 = smov [#allocation2]  }
  0x4c   : > { %1103 = vrot.lane.b32.xlu0 %v210_v10, %s1816_s12 }
  0x4e   : > { %1105 = vrot.lane.b32.xlu1 %v218_v14, %s1816_s12 }
  0x50   : > { %1107 = vrot.lane.b32.xlu0 %v217_v15, %s1816_s12 }
  0x52   : > { %1109 = vrot.lane.b32.xlu1 %v219_v17, %s1816_s12  ;;  %s1746_s12 = sshll.u32 %s1818_s11, 4  ;;  %s1747_s12 = int_to_ptr.vmem [resolvable:$false] %s1746_s12 }
  0x53   : > { %p1749_p0 = scmp.lt.s32.totalorder %s2064_s6, %s1747_s12 }
  0x54   : > { %1232 = vrot.lane.b32.xlu0 %v210_v10, %s1817_s13 }
  0x56   : > { %1234 = vrot.lane.b32.xlu1 %v218_v14, %s1817_s13 }
  0x58   : > { %1236 = vrot.lane.b32.xlu0 %v217_v15, %s1817_s13 }
  0x5a   : > { %1238 = vrot.lane.b32.xlu1 %v219_v17, %s1817_s13  ;;  %s1748_s13 = scalar_lea.vmem %s1747_s12, 768 }
  0x5b   : > { %p1750_p1 = scmp.lt.s32.totalorder %s1748_s13, %s1742_s10 }
  0x5c   : > { %1343 = vperm.xlu0 %1720, %v1340_v18  }
  0x5d   : > { %p1751_p2 = por %p1750_p1, %p1749_p0 }
  0x5e   : > { %1352 = vperm.xlu1 %1721, %v1349_v19  }
  0x5f   : > { %p1752_p3 = pnand %p1751_p2, %p1745_p13 }
  0x8e   : > { %v221_v20 = vpop.permute.xlu0 %220 }
  0x90   : > { %v225_v21 = vpop.permute.xlu1 %224 }
  0x92   : > { %v223_v22 = vpop.permute.xlu0 %222 }
  0x93   : > { %v230_v24 = vsel %vm228_vm1, %v223_v22, %v225_v21  ;;  %v229_v25 = vsel %vm228_vm1, %v221_v20, %v223_v22 }
  0x94   : > { %1493 = vmatprep.subr.msk.bf16.mxu0 %vm236_vm2, %v230_v24  ;;  %v227_v26 = vpop.permute.xlu1 %226  ;;  %v238_v27 = vsel %vm236_vm2, %v229_v25, 0 }
  0x95   : > { %247 = vmatpush1.bf16.msra.mxu0 %v238_v27  ;;  %v231_v28 = vsel %vm228_vm1, %v225_v21, %v227_v26  ;;  %v1511_v21 = vld [vmem:[%s2105_s1 + $0x14] sm:$0xf] }
  0x96   : > { %v244_v30 = vsel %vm236_vm2, %v231_v28, 0  ;;  %1496 = vmatprep.subr.msk.bf16.mxu0 %vm236_vm2, %v343_v23  ;;  %v459_v32 = vpop.permute.xlu0 %458 }
  0x97   : > { %1550 = vmatpush3.bf16.msra.mxu1 %v244_v30 }
  0x98   : > { %1494 = vmatmul.mubr.msk.bf16.vlgmr.msra.gmra.mrb[0].mxu0 %vm232_vm3, %v1492_v29  ;;  %1555 = vmatprep.subr.bf16.mxu1 %v1807_v5  ;;  %v461_v34 = vpop.permute.xlu1 %460 }
  0x99   : > { %357 = vmatpush1.bf16.msra.mxu0 %v348_v31  ;;  %388 = vmatprep.mubr.bf16.mxu0 %v1808_v6  ;;  %v467_v39 = vsel %vm466_vm4, %v459_v32, %v461_v34  ;;  %v1515_v31 = vld [vmem:[%s2105_s1 + $0x18] sm:$0xf] }
  0x9a   : > { %1552 = vmatmul.mubr.msk.bf16.vlgmr.msra.gmra.mrb[0].mxu1 %vm232_vm3, %v1492_v29  ;;  %v463_v35 = vpop.permute.xlu0 %462  ;;  %v474_v43 = vsel %vm236_vm2, %v467_v39, 0 }
  0x9b   : > { %1556 = vmatpush3.bf16.msra.mxu1 %v354_v33  ;;  %v468_v36 = vsel %vm466_vm4, %v461_v34, %v463_v35  ;;  %1557 = vmatprep.mubr.msk.bf16.mxu1 %vm1809_vm0, %v1807_v5 }
  0x9c   : > { %1500 = vmatprep.subr.msk.bf16.mxu0 %vm236_vm2, %v468_v36  ;;  %v465_v37 = vpop.permute.xlu1 %464  ;;  %1561 = vmatprep.subr.bf16.mxu1 %v1807_v5 }
  0x9d   : > { %v469_v41 = vsel %vm466_vm4, %v463_v35, %v465_v37 }
  0x9e   : > { %v588_v38 = vpop.permute.xlu0 %587  ;;  %v480_v46 = vsel %vm236_vm2, %v469_v41, 0  ;;  %v1523_v41 = vld [vmem:[%s2105_s1 + $0x20] sm:$0xf] }
  0xa0   : > { %v590_v40 = vpop.permute.xlu1 %589 }
  0xa1   : > { %v596_v49 = vsel %vm595_vm5, %v588_v38, %v590_v40  ;;  %v1519_v38 = vld [vmem:[%s2105_s1 + $0x1c] sm:$0xf] }
  0xa2   : > { %v592_v44 = vpop.permute.xlu0 %591  ;;  %v603_v54 = vsel %vm236_vm2, %v596_v49, 0 }
  0xa3   : > { %v597_v45 = vsel %vm595_vm5, %v590_v40, %v592_v44 }
  0xa4   : > { %1497 = vmatmul.mubr.msk.bf16.vlgmr.msra.gmra.mrb[0].mxu0 %vm232_vm3, %v198_v42  ;;  %v594_v48 = vpop.permute.xlu1 %593 }
  0xa5   : > { %483 = vmatpush1.bf16.msra.mxu0 %v474_v43  ;;  %514 = vmatprep.mubr.bf16.mxu0 %v1808_v6  ;;  %v598_v52 = vsel %vm595_vm5, %v592_v44, %v594_v48 }
  0xa6   : > { %1558 = vmatmul.mubr.msk.bf16.vlgmr.msra.gmra.mrb[0].mxu1 %vm232_vm3, %v198_v42  ;;  %1504 = vmatprep.subr.msk.bf16.mxu0 %vm236_vm2, %v597_v45  ;;  %v717_v47 = vpop.permute.xlu0 %716  ;;  %v609_v56 = vsel %vm236_vm2, %v598_v52, 0 }
  0xa7   : > { %1562 = vmatpush3.bf16.msra.mxu1 %v480_v46  ;;  %1563 = vmatprep.mubr.msk.bf16.mxu1 %vm1809_vm0, %v1807_v5 }
  0xa8   : > { %1567 = vmatprep.subr.bf16.mxu1 %v1807_v5  ;;  %v719_v50 = vpop.permute.xlu1 %718 }
  0xa9   : > { %v725_v59 = vsel %vm724_vm6, %v717_v47, %v719_v50 }
  0xaa   : > { %v721_v51 = vpop.permute.xlu0 %720  ;;  %v732_v0 = vsel %vm236_vm2, %v725_v59, 0 }
  0xab   : > { %v726_v55 = vsel %vm724_vm6, %v719_v50, %v721_v51 }
  0xac   : > { %v723_v58 = vpop.permute.xlu1 %722 }
  0xad   : > { %v727_v62 = vsel %vm724_vm6, %v721_v51, %v723_v58 }
  0xae   : > { %v846_v57 = vpop.permute.xlu0 %845  ;;  %v738_v2 = vsel %vm236_vm2, %v727_v62, 0 }
  0xb0   : > { %1501 = vmatmul.mubr.msk.bf16.vlgmr.msra.gmra.mrb[0].mxu0 %vm232_vm3, %v1499_v53  ;;  %v848_v60 = vpop.permute.xlu1 %847 }
  0xb1   : > { %612 = vmatpush1.bf16.msra.mxu0 %v603_v54  ;;  %643 = vmatprep.mubr.bf16.mxu0 %v1808_v6  ;;  %v854_v7 = vsel %vm853_vm7, %v846_v57, %v848_v60 }
  0xb2   : > { %1564 = vmatmul.mubr.msk.bf16.vlgmr.msra.gmra.mrb[0].mxu1 %vm232_vm3, %v1499_v53  ;;  %1508 = vmatprep.subr.msk.bf16.mxu0 %vm236_vm2, %v726_v55  ;;  %v850_v61 = vpop.permute.xlu0 %849  ;;  %v861_v12 = vsel %vm236_vm2, %v854_v7, 0 }
  0xb3   : > { %1568 = vmatpush3.bf16.msra.mxu1 %v609_v56  ;;  %1569 = vmatprep.mubr.msk.bf16.mxu1 %vm1809_vm0, %v1807_v5  ;;  %v855_v1 = vsel %vm853_vm7, %v848_v60, %v850_v61 }
  0xb4   : > { %1573 = vmatprep.subr.bf16.mxu1 %v1807_v5  ;;  %v852_v4 = vpop.permute.xlu1 %851 }
  0xb5   : > { %v856_v10 = vsel %vm853_vm7, %v850_v61, %v852_v4 }
  0xb6   : > { %v975_v3 = vpop.permute.xlu0 %974  ;;  %v867_v14 = vsel %vm236_vm2, %v856_v10, 0 }
  0xb8   : > { %v977_v8 = vpop.permute.xlu1 %976 }
  0xb9   : > { %v983_v17 = vsel %vm982_vm8, %v975_v3, %v977_v8 }
  0xba   : > { %v979_v9 = vpop.permute.xlu0 %978  ;;  %v990_v22 = vsel %vm236_vm2, %v983_v17, 0 }
  0xbb   : > { %v984_v13 = vsel %vm982_vm8, %v977_v8, %v979_v9 }
  0xbc   : > { %1505 = vmatmul.mubr.msk.bf16.vlgmr.msra.gmra.mrb[0].mxu0 %vm232_vm3, %v1503_v63  ;;  %v981_v16 = vpop.permute.xlu1 %980 }
  0xbd   : > { %741 = vmatpush1.bf16.msra.mxu0 %v732_v0  ;;  %772 = vmatprep.mubr.bf16.mxu0 %v1808_v6  ;;  %v985_v20 = vsel %vm982_vm8, %v979_v9, %v981_v16 }
  0xbe   : > { %1570 = vmatmul.mubr.msk.bf16.vlgmr.msra.gmra.mrb[0].mxu1 %vm232_vm3, %v1503_v63  ;;  %1512 = vmatprep.subr.msk.bf16.mxu0 %vm236_vm2, %v855_v1  ;;  %v1104_v15 = vpop.permute.xlu0 %1103  ;;  %v996_v24 = vsel %vm236_vm2, %v985_v20, 0 }
  0xbf   : > { %1574 = vmatpush3.bf16.msra.mxu1 %v738_v2  ;;  %1575 = vmatprep.mubr.msk.bf16.mxu1 %vm1809_vm0, %v1807_v5 }
  0xc0   : > { %1579 = vmatprep.subr.bf16.mxu1 %v1807_v5  ;;  %v1106_v18 = vpop.permute.xlu1 %1105 }
  0xc1   : > { %v1112_v27 = vsel %vm1111_vm9, %v1104_v15, %v1106_v18 }
  0xc2   : > { %v1108_v19 = vpop.permute.xlu0 %1107  ;;  %v1119_v32 = vsel %vm236_vm2, %v1112_v27, 0 }
  0xc3   : > { %v1113_v23 = vsel %vm1111_vm9, %v1106_v18, %v1108_v19 }
  0xc4   : > { %v1110_v26 = vpop.permute.xlu1 %1109 }
  0xc5   : > { %v1114_v30 = vsel %vm1111_vm9, %v1108_v19, %v1110_v26 }
  0xc6   : > { %v1233_v25 = vpop.permute.xlu0 %1232  ;;  %v1125_v34 = vsel %vm236_vm2, %v1114_v30, 0 }
  0xc8   : > { %1509 = vmatmul.mubr.msk.bf16.vlgmr.msra.gmra.mrb[0].mxu0 %vm232_vm3, %v1507_v11  ;;  %v1235_v28 = vpop.permute.xlu1 %1234 }
  0xc9   : > { %870 = vmatpush1.bf16.msra.mxu0 %v861_v12  ;;  %901 = vmatprep.mubr.bf16.mxu0 %v1808_v6  ;;  %v1241_v36 = vsel %vm1240_vm10, %v1233_v25, %v1235_v28 }
  0xca   : > { %1576 = vmatmul.mubr.msk.bf16.vlgmr.msra.gmra.mrb[0].mxu1 %vm232_vm3, %v1507_v11  ;;  %1516 = vmatprep.subr.msk.bf16.mxu0 %vm236_vm2, %v984_v13  ;;  %v1237_v29 = vpop.permute.xlu0 %1236  ;;  %v1248_v39 = vsel %vm236_vm2, %v1241_v36, 0 }
  0xcb   : > { %1580 = vmatpush3.bf16.msra.mxu1 %v867_v14  ;;  %1581 = vmatprep.mubr.msk.bf16.mxu1 %vm1809_vm0, %v1807_v5  ;;  %v1242_v33 = vsel %vm1240_vm10, %v1235_v28, %v1237_v29 }
  0xcc   : > { %1585 = vmatprep.subr.bf16.mxu1 %v1807_v5  ;;  %v1239_v35 = vpop.permute.xlu1 %1238 }
  0xcd   : > { %v1243_v37 = vsel %vm1240_vm10, %v1237_v29, %v1239_v35 }
  0xce   : > { %v1254_v40 = vsel %vm236_vm2, %v1243_v37, 0 }
  0xd4   : > { %1513 = vmatmul.mubr.msk.bf16.vlgmr.msra.gmra.mrb[0].mxu0 %vm232_vm3, %v1511_v21 }
  0xd5   : > { %999 = vmatpush1.bf16.msra.mxu0 %v990_v22  ;;  %1030 = vmatprep.mubr.bf16.mxu0 %v1808_v6 }
  0xd6   : > { %1582 = vmatmul.mubr.msk.bf16.vlgmr.msra.gmra.mrb[0].mxu1 %vm232_vm3, %v1511_v21  ;;  %1520 = vmatprep.subr.msk.bf16.mxu0 %vm236_vm2, %v1113_v23 }
  0xd7   : > { %1586 = vmatpush3.bf16.msra.mxu1 %v996_v24  ;;  %1587 = vmatprep.mubr.msk.bf16.mxu1 %vm1809_vm0, %v1807_v5 }
  0xd8   : > { %1591 = vmatprep.subr.bf16.mxu1 %v1807_v5 }
  0xdb   : > { %v1344_v42 = vpop.permute.xlu0 %1343 }
  0xdd   : > { %v1353_v44 = vpop.permute.xlu1 %1352 }
  0xe0   : > { %1517 = vmatmul.mubr.msk.bf16.vlgmr.msra.gmra.mrb[0].mxu0 %vm232_vm3, %v1515_v31 }
  0xe1   : > { %1128 = vmatpush1.bf16.msra.mxu0 %v1119_v32  ;;  %1159 = vmatprep.mubr.bf16.mxu0 %v1808_v6 }
  0xe2   : > { %1588 = vmatmul.mubr.msk.bf16.vlgmr.msra.gmra.mrb[0].mxu1 %vm232_vm3, %v1515_v31  ;;  %1524 = vmatprep.subr.msk.bf16.mxu0 %vm236_vm2, %v1242_v33 }
  0xe3   : > { %1592 = vmatpush3.bf16.msra.mxu1 %v1125_v34  ;;  %1593 = vmatprep.mubr.msk.bf16.mxu1 %vm1809_vm0, %v1807_v5 }
  0xe4   : > { %1597 = vmatprep.subr.bf16.mxu1 %v1807_v5 }
  0xec   : > { %1521 = vmatmul.mubr.msk.bf16.vlgmr.msra.gmra.mrb[0].mxu0 %vm232_vm3, %v1519_v38 }
  0xed   : > { %1257 = vmatpush1.bf16.msra.mxu0 %v1248_v39  ;;  %1288 = vmatprep.mubr.bf16.mxu0 %v1808_v6 }
  0xee   : > { %1594 = vmatmul.mubr.msk.bf16.vlgmr.msra.gmra.mrb[0].mxu1 %vm232_vm3, %v1519_v38 }
  0xef   : > { %1598 = vmatpush3.bf16.msra.mxu1 %v1254_v40  ;;  %1599 = vmatprep.mubr.msk.bf16.mxu1 %vm1809_vm0, %v1807_v5 }
  0xf8   : > { %1525 = vmatmul.mubr.msk.bf16.vlgmr.msra.gmra.mrb[0].mxu0 %vm232_vm3, %v1523_v41 }
  0xfa   : > { %1600 = vmatmul.mubr.msk.bf16.vlgmr.msra.gmra.mrb[0].mxu1 %vm232_vm3, %v1523_v41 }
 0x1cb   : > { %v1290_v43 = vpop.f32.mrb[0].mxu0 }
 0x1cc   : > { %v1346_v45 = vmul.f32 %v1344_v42, %v1290_v43  ;;  %v1292_v46 = vpop.f32.mrb[1].mxu0 }
 0x1cd   : > { %v1347_v6 = vmul.f32 %v1344_v42, %v1292_v46  ;;  %v1294_v47 = vpop.f32.mrb[2].mxu0  ;;  %v1331_v48 = vpop.f32.mrb[0].mxu1 }
 0x1ce   : > { %v2042_v49 = vadd.f32 %v1353_v44, %v1346_v45  ;;  %v1348_v50 = vmul.f32 %v1344_v42, %v1331_v48  ;;  %v1295_v5 = vpop.f32.mrb[3].mxu0  ;;  %v1601_v51 = vpop.f32.mrb[1].mxu1 }
 0x1cf   : > { %v2044_v52 = vadd.f32 %v1353_v44, %v1347_v6  ;;  %v1334_v53 = vpop.f32.mrb[2].mxu1 }
 0x1d0   : > { %v1361_v54 = vand.u32 2147483647, %v2042_v49  ;;  %v2047_v55 = vadd.f32 %v1353_v44, %v1348_v50  ;;  %v1602_v56 = vpop.f32.mrb[3].mxu1  ;;  %v1358_v20 = vmax.f32 %v2042_v49, 0.0 }
 0x1d1   : > { %v1362_v57 = vand.u32 2147483647, %v2044_v52  ;;  %v1359_v24 = vmax.f32 %v2044_v52, 0.0 }
 0x1d2   : > { %v1364_v58 = vsub.f32 0.0, %v1361_v54  ;;  %v1363_v59 = vand.u32 2147483647, %v2047_v55  ;;  %v1360_v32 = vmax.f32 %v2047_v55, 0.0 }
 0x1d3   : > { %v1365_v60 = vsub.f32 0.0, %v1362_v57 }
 0x1d4   : > { %v1367_v61 = vmul.f32 1.442695, %v1364_v58  ;;  %v1366_v62 = vsub.f32 0.0, %v1363_v59 }
 0x1d5   : > { %v1369_v63 = vmul.f32 1.442695, %v1365_v60 }
 0x1d6   : > { %1724 = vpow2.f32 %v1367_v61  ;;  %v1371_v0 = vmul.f32 1.442695, %v1366_v62 }
 0x1d7   : > { %1726 = vpow2.f32 %v1369_v63 }
 0x1d8   : > { %1728 = vpow2.f32 %v1371_v0 }
 0x1e0   : > { %v1725_v1 = vpop.eup %1724 }
 0x1e1   : > { %v1727_v2 = vpop.eup %1726  ;;  %v1373_v3 = vadd.f32 1.0, %v1725_v1  ;;  %v1376_v9 = vmul.f32 -0.5, %v1725_v1  ;;  %v1379_v13 = vand.u32 2147483647, %v1725_v1 }
 0x1e2   : > { %v1729_v4 = vpop.eup %1728  ;;  %v1382_v7 = vadd.f32 1.0, %v1727_v2  ;;  %v1385_v10 = vmul.f32 -0.5, %v1727_v2  ;;  %v1388_v15 = vand.u32 2147483647, %v1727_v2 }
 0x1e3   : > { %1730 = vlog2.f32 %v1373_v3  ;;  %v1391_v8 = vadd.f32 1.0, %v1729_v4  ;;  %v1394_v11 = vmul.f32 -0.5, %v1729_v4  ;;  %v1377_v12 = vadd.f32 1.0, %v1376_v9 }
 0x1e4   : > { %1732 = vlog2.f32 %v1382_v7  ;;  %v1386_v14 = vadd.f32 1.0, %v1385_v10  ;;  %v1397_v18 = vand.u32 2147483647, %v1729_v4  ;;  %vm1380_vm11 = vcmp.lt.f32.partialorder %v1379_v13, 0.0004427343 }
 0x1e5   : > { %1734 = vlog2.f32 %v1391_v8  ;;  %v1395_v16 = vadd.f32 1.0, %v1394_v11  ;;  %v1378_v22 = vmul.f32 %v1725_v1, %v1377_v12  ;;  %vm1389_vm12 = vcmp.lt.f32.partialorder %v1388_v15, 0.0004427343 }
 0x1e6   : > { %v1387_v26 = vmul.f32 %v1727_v2, %v1386_v14  ;;  %vm1398_vm13 = vcmp.lt.f32.partialorder %v1397_v18, 0.0004427343 }
 0x1e7   : > { %v1396_v29 = vmul.f32 %v1729_v4, %v1395_v16 }
 0x1ed   : > { %v1731_v17 = vpop.eup %1730 }
 0x1ee   : > { %v1733_v19 = vpop.eup %1732  ;;  %v1375_v21 = vmul.f32 0.6931472, %v1731_v17 }
 0x1ef   : > { %v1735_v23 = vpop.eup %1734  ;;  %v1384_v25 = vmul.f32 0.6931472, %v1733_v19 }
 0x1f0   : > { %v1381_v27 = vsel %vm1380_vm11, %v1378_v22, %v1375_v21  ;;  %v1393_v28 = vmul.f32 0.6931472, %v1735_v23 }
 0x1f1   : > { %v1390_v30 = vsel %vm1389_vm12, %v1387_v26, %v1384_v25  ;;  %v1400_v31 = vadd.f32 %v1381_v27, %v1358_v20 }
 0x1f2   : > { %v1401_v33 = vadd.f32 %v1390_v30, %v1359_v24  ;;  %v1399_v34 = vsel %vm1398_vm13, %v1396_v29, %v1393_v28 }
 0x1f3   : > { %1736 = vtanh.f32 %v1400_v31  ;;  %v1402_v35 = vadd.f32 %v1399_v34, %v1360_v32 }
 0x1f4   : > { %1738 = vtanh.f32 %v1401_v33 }
 0x1f5   : > { %1740 = vtanh.f32 %v1402_v35 }
 0x1fd   : > { %v1737_v36 = vpop.eup %1736 }
 0x1fe   : > { %v1739_v37 = vpop.eup %1738  ;;  %v1406_v38 = vmul.f32 %v1737_v36, %v2042_v49 }
 0x1ff   : > { %v1741_v39 = vpop.eup %1740  ;;  %v1407_v40 = vmul.f32 %v1739_v37, %v2044_v52 }
 0x200   : > { %1409 = vst [vmem:[%s190_s5] sm:$0xff] %v1406_v38  ;;  %v1408_v41 = vmul.f32 %v1741_v39, %v2047_v55 }
 0x201   : > { %1410 = vst [vmem:[%s190_s5 + $0x8] sm:$0xff] %v1407_v40 }
 0x202   : > { %1411 = vst [vmem:[%s190_s5 + $0x10] sm:$0xff] %v1408_v41 }
 0x203   : > { %1755 = shalt.err (!%p1752_p3)
}
 0x204   : > { %s1756_s14 = scalar_lea.hbm %s2062_s9, 384  ;;  %s1760_s23 = scalar_lea.hbm %s2108_s4, 768 }
 0x205   : > { %p1757_p4 = scmp.ne.s32.totalorder %s2062_s9, %s1756_s14  ;;  %p1761_p9 = scmp.lt.u32.totalorder %s2062_s9, %s2108_s4 }
 0x206   : > { %p1762_p10 = scmp.lt.u32.totalorder %s1760_s23, %s1756_s14  ;;  %p1764_p12 = scmp.lt.u32.totalorder %s1756_s14, %s2062_s9 }
 0x207   : > { %p1758_p7 = pnand %p1757_p4, %p1882_p5 }
 0x208   : > { %p1763_p11 = por %p1762_p10, %p1761_p9 }
 0x209   : > { %p1759_p8 = pneg %p1758_p7 }
 0x20a   : > { %p1765_p13 = por %p1764_p12, %p1763_p11 }
 0x20c   : > { %p1766_p0 = pnand %p1765_p13, %p1759_p8 }
 0x20e   : > { %1769 = shalt.err (!%p1766_p0)
}
 0x20f   : > { %1669 = dma.vmem_to_hbm [thread:$0]  (%p1882_p5), %s2064_s6, 384, %s2062_s9, %s1413_s19  }
 0x210 PF: > { %p1675_p1 = scmp.ge.s32.totalorder %s1804_s18, 2  ;;  %s1439_s29 = sand.u32 1, %s1792_s15  }
 0x211   : > { %s1440_s30 = scalar_lea.sflag [#allocation3], %s1439_s29 }
 0x212   : > { %p1672_p2 = pnand %p1675_p1, %p1886_p6 }
 0x214   : > { %1787 = dma.done.wait (!%p1672_p2), %s1440_s30, 384  }
 0x215   : > { %1789 = vsyncadd (!%p1672_p2), %s1440_s30, 4294966912  ;;  %p14_p3 = scmp.ge.s32.totalorder %s1869_s21, 4   ;;  %s2111_s15 = smov %s1796_s16 }
 0x216   : > { %s2112_s16 = smov %s1800_s17  ;;  %s2113_s17 = smov %s1880_s24 }
 0x217   : > { %s2114_s18 = smov %s1869_s21  ;;  %16 = sbr.rel (!%p14_p3) target bundleno = 3 (0x3), region = 79 }
 0x21e   :  { %1445 = vsyncpa [#allocation3], 1 }
 0x21f   :  { %1447 = vsyncpa [#allocation3 + $0x1], 1 }

</bundles_post_ra>
